<compile_context>
chip_gen: v7x
topology: tpu7x:2x2x1
jax: 0.10.0
libtpu: 0.0.40
codegen_flags: <defaults>
</compile_context>

<pallas_src>
import functools

import jax
import jax.numpy as jnp
from jax.experimental import pallas as pl
from jax.experimental.pallas import tpu as pltpu

_BN_EPS = 1e-5    # nn.BatchNorm1d default eps
_L2_EPS = 1e-12   # F.normalize default eps


def _bn_stats_kernel(x_ref, gamma_ref, beta_ref, ss_ref, *, batch, tile_b):
    """Accumulate per-feature sum / sum-of-squares over batch tiles.

    On the last grid step, convert to the folded BatchNorm affine:
      scale = gamma * rsqrt(var + eps),  shift = beta - mean * scale
    and overwrite the (2, H) output with [scale; shift].
    """
    i = pl.program_id(0)

    @pl.when(i == 0)
    def _():
        ss_ref[...] = jnp.zeros_like(ss_ref)

    x = x_ref[...].astype(jnp.float32)                              # (TB, H)
    # Mask rows that run past the true batch (edge tile safety).
    row = jax.lax.broadcasted_iota(jnp.int32, x.shape, 0) + i * tile_b
    x = jnp.where(row < batch, x, 0.0)

    ss_ref[0:1, :] += jnp.sum(x, axis=0, keepdims=True)             # sum
    ss_ref[1:2, :] += jnp.sum(x * x, axis=0, keepdims=True)         # sum of squares

    @pl.when(i == pl.num_programs(0) - 1)
    def _():
        inv_n = jnp.float32(1.0 / batch)
        mean = ss_ref[0:1, :] * inv_n
        var = ss_ref[1:2, :] * inv_n - mean * mean                  # biased (training BN)
        inv_std = jax.lax.rsqrt(var + jnp.float32(_BN_EPS))         # EUP
        scale = gamma_ref[...].astype(jnp.float32) * inv_std
        shift = beta_ref[...].astype(jnp.float32) - mean * scale
        ss_ref[0:1, :] = scale
        ss_ref[1:2, :] = shift


def _bn_project_kernel(ss_ref, x_ref, wt_ref, b_ref, o_ref):
    """Apply folded BN affine + fused L2 row-normalization + projection tile."""
    scale = ss_ref[0:1, :]                                          # (1, H)
    shift = ss_ref[1:2, :]                                          # (1, H)

    x = x_ref[...].astype(jnp.float32)                              # (TB, H)
    xb = x * scale + shift                                          # BatchNorm1d

    # F.normalize(dim=-1): xb / max(||xb||, 1e-12) == xb * rsqrt(max(||xb||^2, 1e-24))
    ssq = jnp.sum(xb * xb, axis=-1, keepdims=True)                  # (TB, 1)
    xn = xb * jax.lax.rsqrt(jnp.maximum(ssq, jnp.float32(_L2_EPS * _L2_EPS)))

    y = jnp.dot(xn, wt_ref[...], preferred_element_type=jnp.float32)  # MXU, (TB, TO)
    o_ref[...] = (y + b_ref[...]).astype(o_ref.dtype)


def _pick_tile(dim, cap, align):
    if dim <= cap:
        return dim                       # full dim satisfies the (8,128) block rule
    return max(align, (cap // align) * align)


def batchnorm_project(x, gamma, beta, weight, bias, *, tile_b=256, tile_o=512):
    """x: (B, H) f32, gamma/beta: (H,), weight: (O, H), bias: (O,). Returns (B, O)."""
    B, H = x.shape
    O, Hw = weight.shape
    assert Hw == H

    tb = _pick_tile(B, tile_b, 8)        # batch tile (sublane axis, multiple of 8)
    to = _pick_tile(O, tile_o, 128)      # output tile (lane axis, multiple of 128)
    nb = pl.cdiv(B, tb)
    no = pl.cdiv(O, to)
    # TODO(synk): for very large hidden_dim, additionally tile the H contraction
    # (K-axis grid with a VMEM accumulator); full-H tiles are fine here.

    # ---- Kernel 1: batch statistics -> folded (scale, shift) -------------------
    scale_shift = pl.pallas_call(
        functools.partial(_bn_stats_kernel, batch=B, tile_b=tb),
        out_shape=jax.ShapeDtypeStruct((2, H), jnp.float32),
        grid=(nb,),
        in_specs=[
            pl.BlockSpec((tb, H), lambda i: (i, 0)),
            pl.BlockSpec((1, H), lambda i: (0, 0)),
            pl.BlockSpec((1, H), lambda i: (0, 0)),
        ],
        out_specs=pl.BlockSpec((2, H), lambda i: (0, 0)),   # resident accumulator
        compiler_params=pltpu.CompilerParams(
            dimension_semantics=("arbitrary",)),
    )(x, gamma.reshape(1, H), beta.reshape(1, H))

    # ---- Kernel 2: BN affine + L2 normalize + projection -----------------------
    # Rough per-step VMEM footprint (double-buffered tiles), with headroom; clamp
    # so the limit is also valid on v7x (64 MiB physical VMEM per TensorCore).
    tile_bytes = 2 * 4 * (tb * H + H * to + to + 2 * H + tb * to)
    vmem_limit = int(min(max(3 * tile_bytes, 8 << 20), 48 << 20))

    out = pl.pallas_call(
        _bn_project_kernel,
        out_shape=jax.ShapeDtypeStruct((B, O), x.dtype),
        grid=(nb, no),
        in_specs=[
            pl.BlockSpec((2, H), lambda i, j: (0, 0)),      # folded BN scale/shift
            pl.BlockSpec((tb, H), lambda i, j: (i, 0)),     # input rows
            pl.BlockSpec((H, to), lambda i, j: (0, j)),     # weight^T (lane-dense out)
            pl.BlockSpec((1, to), lambda i, j: (0, j)),     # bias
        ],
        out_specs=pl.BlockSpec((tb, to), lambda i, j: (i, j)),
        compiler_params=pltpu.CompilerParams(
            dimension_semantics=("parallel", "parallel"),
            vmem_limit_bytes=vmem_limit),
    )(scale_shift, x, weight.T, bias.reshape(1, O))
    return out


def _reference(x, gamma, beta, weight, bias):
    mean = jnp.mean(x, axis=0, keepdims=True)
    var = jnp.mean((x - mean) ** 2, axis=0, keepdims=True)
    xb = (x - mean) * jax.lax.rsqrt(var + _BN_EPS) * gamma + beta
    norm = jnp.sqrt(jnp.sum(xb * xb, axis=-1, keepdims=True))
    xn = xb / jnp.maximum(norm, _L2_EPS)
    return jnp.dot(xn, weight.T, precision=jax.lax.Precision.HIGHEST) + bias


if __name__ == "__main__":
    B, H, O = 8, 32, 16      # batch, hidden_dim, output_dim
    key = jax.random.PRNGKey(0)
    kx, kw, kb, kg, kbe = jax.random.split(key, 5)

    x = jax.random.normal(kx, (B, H), jnp.float32)
    bound = 1.0 / (H ** 0.5)                                   # nn.Linear default init
    weight = jax.random.uniform(kw, (O, H), jnp.float32, -bound, bound)
    bias = jax.random.uniform(kb, (O,), jnp.float32, -bound, bound)
    # Perturbed BN affine so the scale/shift path is actually exercised.
    gamma = 1.0 + 0.1 * jax.random.normal(kg, (H,), jnp.float32)
    beta = 0.1 * jax.random.normal(kbe, (H,), jnp.float32)

    out = batchnorm_project(x, gamma, beta, weight, bias)
    jax.block_until_ready(out)
    assert out.shape == (B, O)

    ref = _reference(x, gamma, beta, weight, bias)
    assert jnp.allclose(out, ref, rtol=2e-3, atol=2e-3), float(jnp.max(jnp.abs(out - ref)))
    print("KERNEL_OK")
</pallas_src>

<mosaic_0001>
module attributes {stable_mosaic.version = 11 : i64} {
  func.func @_bn_stats_kernel(%arg0: i32, %arg1: memref<8x32xf32, #tpu.memory_space<vmem>>, %arg2: memref<1x32xf32, #tpu.memory_space<vmem>>, %arg3: memref<1x32xf32, #tpu.memory_space<vmem>>, %arg4: memref<2x32xf32, #tpu.memory_space<vmem>>) attributes {dimension_semantics = [#tpu.dimension_semantics<arbitrary>], iteration_bounds = array<i64: 1>, scalar_prefetch = 0 : i64, scratch_operands = 0 : i64, tpu.core_type = #tpu.core_type<tc>, window_params = [{transform_indices = @transform_0, window_bounds = array<i64: 8, 32>}, {pipeline_mode = #tpu.pipeline_mode<synchronous>, transform_indices = @transform_1, window_bounds = array<i64: 1, 32>}, {pipeline_mode = #tpu.pipeline_mode<synchronous>, transform_indices = @transform_2, window_bounds = array<i64: 1, 32>}, {pipeline_mode = #tpu.pipeline_mode<synchronous>, transform_indices = @transform_3, window_bounds = array<i64: 2, 32>}]} {
    %c0_i32 = arith.constant 0 : i32
    %0 = arith.cmpi eq, %arg0, %c0_i32 : i32
    %1 = arith.extui %0 : i1 to i32
    %c0_i32_0 = arith.constant 0 : i32
    %2 = arith.cmpi ne, %1, %c0_i32_0 : i32
    scf.if %2 {
      %cst_14 = arith.constant 0.000000e+00 : f32
      %26 = vector.broadcast %cst_14 : f32 to vector<2x32xf32>
      %c0_15 = arith.constant 0 : index
      %c0_16 = arith.constant 0 : index
      %27 = vector.load %arg4[%c0_15, %c0_16] : memref<2x32xf32, #tpu.memory_space<vmem>>, vector<2x32xf32>
      tpu.vector_store %arg4[%c0_15, %c0_16], %26 {strides = array<i32>} : memref<2x32xf32, #tpu.memory_space<vmem>>, vector<2x32xf32>,
    } else {
    }
    %c0 = arith.constant 0 : index
    %c0_1 = arith.constant 0 : index
    %3 = vector.load %arg1[%c0, %c0_1] : memref<8x32xf32, #tpu.memory_space<vmem>>, vector<8x32xf32>
    %4 = tpu.iota {dimensions = array<i32: 0>} : vector<8x32xi32>
    %c8_i32 = arith.constant 8 : i32
    %5 = arith.muli %arg0, %c8_i32 : i32
    %6 = vector.broadcast %5 : i32 to vector<8x32xi32>
    %7 = arith.addi %4, %6 : vector<8x32xi32>
    %c8_i32_2 = arith.constant 8 : i32
    %8 = vector.broadcast %c8_i32_2 : i32 to vector<8x32xi32>
    %9 = arith.cmpi slt, %7, %8 : vector<8x32xi32>
    %cst = arith.constant 0.000000e+00 : f32
    %10 = vector.broadcast %cst : f32 to vector<8x32xf32>
    %11 = arith.select %9, %3, %10 : vector<8x32xi1>, vector<8x32xf32>
    %c0_3 = arith.constant 0 : index
    %c0_4 = arith.constant 0 : index
    %12 = vector.load %arg4[%c0_3, %c0_4] : memref<2x32xf32, #tpu.memory_space<vmem>>, vector<1x32xf32>
    %cst_5 = arith.constant dense<0.000000e+00> : vector<32xf32>
    %13 = vector.multi_reduction <add>, %11, %cst_5 [0] : vector<8x32xf32> to vector<32xf32>
    %14 = vector.shape_cast %13 : vector<32xf32> to vector<1x32xf32>
    %15 = arith.addf %12, %14 : vector<1x32xf32>
    %c0_6 = arith.constant 0 : index
    %c0_7 = arith.constant 0 : index
    %16 = vector.load %arg4[%c0_6, %c0_7] : memref<2x32xf32, #tpu.memory_space<vmem>>, vector<1x32xf32>
    tpu.vector_store %arg4[%c0_6, %c0_7], %15 {strides = array<i32>} : memref<2x32xf32, #tpu.memory_space<vmem>>, vector<1x32xf32>,
    %c1 = arith.constant 1 : index
    %c0_8 = arith.constant 0 : index
    %17 = vector.load %arg4[%c1, %c0_8] : memref<2x32xf32, #tpu.memory_space<vmem>>, vector<1x32xf32>
    %18 = arith.mulf %11, %11 : vector<8x32xf32>
    %cst_9 = arith.constant dense<0.000000e+00> : vector<32xf32>
    %19 = vector.multi_reduction <add>, %18, %cst_9 [0] : vector<8x32xf32> to vector<32xf32>
    %20 = vector.shape_cast %19 : vector<32xf32> to vector<1x32xf32>
    %21 = arith.addf %17, %20 : vector<1x32xf32>
    %c1_10 = arith.constant 1 : index
    %c0_11 = arith.constant 0 : index
    %22 = vector.load %arg4[%c1_10, %c0_11] : memref<2x32xf32, #tpu.memory_space<vmem>>, vector<1x32xf32>
    tpu.vector_store %arg4[%c1_10, %c0_11], %21 {strides = array<i32>} : memref<2x32xf32, #tpu.memory_space<vmem>>, vector<1x32xf32>,
    %c0_i32_12 = arith.constant 0 : i32
    %23 = arith.cmpi eq, %arg0, %c0_i32_12 : i32
    %24 = arith.extui %23 : i1 to i32
    %c0_i32_13 = arith.constant 0 : i32
    %25 = arith.cmpi ne, %24, %c0_i32_13 : i32
    scf.if %25 {
      %c0_14 = arith.constant 0 : index
      %c0_15 = arith.constant 0 : index
      %26 = vector.load %arg4[%c0_14, %c0_15] : memref<2x32xf32, #tpu.memory_space<vmem>>, vector<1x32xf32>
      %cst_16 = arith.constant 1.250000e-01 : f32
      %27 = vector.broadcast %cst_16 : f32 to vector<1x32xf32>
      %28 = arith.mulf %26, %27 : vector<1x32xf32>
      %c1_17 = arith.constant 1 : index
      %c0_18 = arith.constant 0 : index
      %29 = vector.load %arg4[%c1_17, %c0_18] : memref<2x32xf32, #tpu.memory_space<vmem>>, vector<1x32xf32>
      %cst_19 = arith.constant 1.250000e-01 : f32
      %30 = vector.broadcast %cst_19 : f32 to vector<1x32xf32>
      %31 = arith.mulf %29, %30 : vector<1x32xf32>
      %32 = arith.mulf %28, %28 : vector<1x32xf32>
      %33 = arith.subf %31, %32 : vector<1x32xf32>
      %cst_20 = arith.constant 9.99999974E-6 : f32
      %34 = vector.broadcast %cst_20 : f32 to vector<1x32xf32>
      %35 = arith.addf %33, %34 : vector<1x32xf32>
      %36 = math.rsqrt %35 : vector<1x32xf32>
      %c0_21 = arith.constant 0 : index
      %c0_22 = arith.constant 0 : index
      %37 = vector.load %arg2[%c0_21, %c0_22] : memref<1x32xf32, #tpu.memory_space<vmem>>, vector<1x32xf32>
      %38 = arith.mulf %37, %36 : vector<1x32xf32>
      %c0_23 = arith.constant 0 : index
      %c0_24 = arith.constant 0 : index
      %39 = vector.load %arg3[%c0_23, %c0_24] : memref<1x32xf32, #tpu.memory_space<vmem>>, vector<1x32xf32>
      %40 = arith.mulf %28, %38 : vector<1x32xf32>
      %41 = arith.subf %39, %40 : vector<1x32xf32>
      %c0_25 = arith.constant 0 : index
      %c0_26 = arith.constant 0 : index
      %42 = vector.load %arg4[%c0_25, %c0_26] : memref<2x32xf32, #tpu.memory_space<vmem>>, vector<1x32xf32>
      tpu.vector_store %arg4[%c0_25, %c0_26], %38 {strides = array<i32>} : memref<2x32xf32, #tpu.memory_space<vmem>>, vector<1x32xf32>,
      %c1_27 = arith.constant 1 : index
      %c0_28 = arith.constant 0 : index
      %43 = vector.load %arg4[%c1_27, %c0_28] : memref<2x32xf32, #tpu.memory_space<vmem>>, vector<1x32xf32>
      tpu.vector_store %arg4[%c1_27, %c0_28], %41 {strides = array<i32>} : memref<2x32xf32, #tpu.memory_space<vmem>>, vector<1x32xf32>,
    } else {
    }
    return
  }
  func.func @transform_0(%arg0: i32) -> (i32, i32) {
    %c0_i32 = arith.constant 0 : i32
    %c0_i32_0 = arith.constant 0 : i32
    return %arg0, %c0_i32 : i32, i32
  }
  func.func @transform_1(%arg0: i32) -> (i32, i32) {
    %c0_i32 = arith.constant 0 : i32
    %c0_i32_0 = arith.constant 0 : i32
    %c0_i32_1 = arith.constant 0 : i32
    return %c0_i32, %c0_i32_0 : i32, i32
  }
  func.func @transform_2(%arg0: i32) -> (i32, i32) {
    %c0_i32 = arith.constant 0 : i32
    %c0_i32_0 = arith.constant 0 : i32
    %c0_i32_1 = arith.constant 0 : i32
    return %c0_i32, %c0_i32_0 : i32, i32
  }
  func.func @transform_3(%arg0: i32) -> (i32, i32) {
    %c0_i32 = arith.constant 0 : i32
    %c0_i32_0 = arith.constant 0 : i32
    %c0_i32_1 = arith.constant 0 : i32
    return %c0_i32, %c0_i32_0 : i32, i32
  }
}

</mosaic_0001>

<bundles_post_ra>
// kernel: tpu_custom_call.1
= control target key start
LH: loop header
LB: loop body
LE: loop exit
PB: predicated region body
PF: predicated region fallthrough
CT: control target
= control target key end

     0   :  { %8 = vsyncpa [#allocation3], 0  ;;  %s207_s0 = inlined_call_operand.hbm [shape: f32[8,32], index: 0, kind: input, shape index: {}]   ;;  %s208_s1 = inlined_call_operand.vmem [shape: f32[1,32], index: 1, kind: input, shape index: {}]   ;;  %s209_s2 = inlined_call_operand.vmem [shape: f32[1,32], index: 2, kind: input, shape index: {}]   ;;  %s210_s3 = inlined_call_operand.hbm [shape: f32[2,32], index: 3, kind: output, shape index: {}]  }
   0x1   :  { %9 = vsyncpa [#allocation4], 0  ;;  %s150_s12 = smov [#allocation2]   ;;  %s102_s16 = scalar_lea.hbm %s207_s0, 128 }
   0x2   :  { %s16_s13 = sshll.u32 %s150_s12, 4  ;;  %p103_p0 = scmp.ne.s32.totalorder %s207_s0, %s102_s16  ;;  %s17_s13 = int_to_ptr.vmem [resolvable:$true] %s16_s13 }
   0x3   :  { %p106_p1 = scmp.lt.u32.totalorder %s102_s16, %s207_s0 }
   0x5   :  { %p108_p2 = pnand %p106_p1, %p103_p0 }
   0x7   :  { %111 = shalt.err (!%p108_p2)
}
   0x8   :  { %s112_s21 = scalar_lea.vmem %s17_s13, 128  ;;  %p117_p4 = scmp.lt.s32.totalorder %s17_s13, %s17_s13 }
   0x9   :  { %p113_p3 = scmp.ne.s32.totalorder %s17_s13, %s112_s21  ;;  %p118_p5 = scmp.lt.s32.totalorder %s112_s21, %s112_s21 }
   0xb   :  { %p119_p6 = por %p118_p5, %p117_p4 }
   0xd   :  { %p120_p7 = pnand %p119_p6, %p113_p3 }
   0xf   :  { %123 = shalt.err (!%p120_p7)
}
  0x10   :  { %19 = dma.hbm_to_vmem [thread:$0]  %s207_s0, 128, %s17_s13, [#allocation3]  }
  0x11   :  { %146 = dma.done.wait [#allocation3], 128  }
  0x12   :  { %147 = vsyncadd [#allocation3], 4294967168  ;;  %vm31_vm0 = vcmask 254976   ;;  %v151_v0 = vmov 0.0   ;;  %vm42_vm1 = vcmask 261120   ;;  %v33_v1 = vld [vmem:[#allocation2] sm:$0xff] }
  0x13   :  { %32 = vst.msk [vmem:[#allocation5] sm:$0x3] %vm31_vm0, %v151_v0  ;;  %v43_v2 = vsel %vm42_vm1, %v33_v1, 0.0  ;;  %v54_v3 = vmul.f32 %v33_v1, %v33_v1  ;;  %vm51_vm2 = vcmask 253952   ;;  %v75_v28 = vld [vmem:[%s208_s1] sm:$0x1] }
  0x14   :  { %v44_v4 = vrot.slane %v43_v2, 4  ;;  %v77_v31 = vld [vmem:[%s209_s2] sm:$0x1]  ;;  %s152_s27 = smov [#allocation5]  }
  0x15   :  { %v55_v5 = vsel %vm42_vm1, %v54_v3, 0.0  ;;  %s88_s28 = sshll.u32 %s152_s27, 4  ;;  %s89_s28 = int_to_ptr.vmem [resolvable:$true] %s88_s28 }
  0x16   :  { %v45_v6 = vadd.f32 %v44_v4, %v43_v2  ;;  %v56_v7 = vrot.slane %v55_v5, 4  ;;  %s124_s29 = scalar_lea.vmem %s89_s28, 32  ;;  %p129_p9 = scmp.lt.s32.totalorder %s89_s28, %s89_s28 }
  0x17   :  { %p125_p8 = scmp.ne.s32.totalorder %s89_s28, %s124_s29  ;;  %p130_p10 = scmp.lt.s32.totalorder %s124_s29, %s124_s29 }
  0x18   :  { %v46_v8 = vrot.slane %v45_v6, 2  ;;  %v57_v9 = vadd.f32 %v56_v7, %v55_v5 }
  0x19   :  { %p131_p11 = por %p130_p10, %p129_p9 }
  0x1a   :  { %v47_v10 = vadd.f32 %v46_v8, %v45_v6  ;;  %v58_v11 = vrot.slane %v57_v9, 2  ;;  %v41_v14 = vld [vmem:[#allocation5] sm:$0x1]  ;;  %v53_v19 = vld [vmem:[#allocation5 + $0x1] sm:$0x1] }
  0x1b   :  { %p132_p12 = pnand %p131_p11, %p125_p8 }
  0x1c   :  { %v48_v12 = vrot.slane %v47_v10, 1  ;;  %v59_v13 = vadd.f32 %v58_v11, %v57_v9 }
  0x1e   :  { %v49_v15 = vadd.f32 %v48_v12, %v47_v10  ;;  %v60_v16 = vrot.slane %v59_v13, 1 }
  0x20   :  { %v50_v17 = vadd.f32 %v49_v15, %v41_v14  ;;  %v61_v18 = vadd.f32 %v60_v16, %v59_v13 }
  0x22   :  { %52 = vst.msk [vmem:[#allocation5] sm:$0x1] %vm51_vm2, %v50_v17  ;;  %v62_v20 = vadd.f32 %v61_v18, %v53_v19 }
  0x24   :  { %63 = vst.msk [vmem:[#allocation5 + $0x1] sm:$0x1] %vm51_vm2, %v62_v20 }
  0x29   :  { %v67_v21 = vld [vmem:[#allocation5] sm:$0x1] }
  0x2a   :  { %v68_v22 = vmul.f32 0.125, %v67_v21 }
  0x2b   :  { %v69_v23 = vld [vmem:[#allocation5 + $0x1] sm:$0x1] }
  0x2c   :  { %v70_v24 = vmul.f32 0.125, %v69_v23  ;;  %v71_v25 = vmul.f32 %v68_v22, %v68_v22 }
  0x2e   :  { %v72_v26 = vsub.f32 %v70_v24, %v71_v25 }
  0x30   :  { %v73_v27 = vadd.f32 1e-05, %v72_v26 }
  0x32   :  { %100 = vrsqrt.f32 %v73_v27 }
  0x3c   :  { %v101_v29 = vpop.eup %100 }
  0x3d   :  { %v76_v30 = vmul.f32 %v101_v29, %v75_v28 }
  0x3f   :  { %v78_v32 = vmul.f32 %v76_v30, %v68_v22  ;;  %80 = vst.msk [vmem:[#allocation5] sm:$0x1] %vm51_vm2, %v76_v30 }
  0x41   :  { %v79_v33 = vsub.f32 %v77_v31, %v78_v32 }
  0x43   :  { %81 = vst.msk [vmem:[#allocation5 + $0x1] sm:$0x1] %vm51_vm2, %v79_v33 }
  0x44   :  { %135 = shalt.err (!%p132_p12)
}
  0x45   :  { %s136_s2 = scalar_lea.hbm %s210_s3, 32 }
  0x46   :  { %p137_p13 = scmp.ne.s32.totalorder %s210_s3, %s136_s2  ;;  %p140_p0 = scmp.lt.u32.totalorder %s136_s2, %s210_s3 }
  0x48   :  { %p142_p1 = pnand %p140_p0, %p137_p13 }
  0x4a   :  { %145 = shalt.err (!%p142_p1)
}
  0x4b   :  { %91 = dma.vmem_to_hbm [thread:$0]  %s89_s28, 32, %s210_s3, [#allocation4]  }
  0x4c   :  { %148 = dma.done.wait [#allocation4], 32  }
  0x4d   :  { %149 = vsyncadd [#allocation4], 4294967264 }
  0x4e   :  { %95 = vsyncpa [#allocation3], 1 }
  0x4f   :  { %96 = vsyncpa [#allocation4], 1 }

</bundles_post_ra>
